<compile_context>
chip_gen: v7x
topology: tpu7x:2x2x1
jax: 0.10.0
libtpu: 0.0.40
codegen_flags: <defaults>
</compile_context>

<pallas_src>
import functools

import jax
import jax.numpy as jnp
from jax.experimental import pallas as pl
from jax.experimental.pallas import tpu as pltpu

LANE = 128


def _round_up(x, m):
    return ((x + m - 1) // m) * m


def dnnet_kernel(x_ref,
                 w1_ref, b1_ref,
                 w2_ref, b2_ref,
                 w3_ref, b3_ref,
                 w4_ref, b4_ref,
                 out_ref):
    """Fused forward pass for one batch tile: 4 matmuls + ReLUs + softmax."""
    x = x_ref[...]                                   # bf16 (tb, n_features)

    # fc1 + relu   (dropout1 is identity in eval mode)
    h = jnp.dot(x, w1_ref[...], preferred_element_type=jnp.float32) + b1_ref[...]
    h = jnp.maximum(h, 0.0)

    # fc2 + relu   (dropout2 is identity in eval mode)
    h = jnp.dot(h.astype(jnp.bfloat16), w2_ref[...],
                preferred_element_type=jnp.float32) + b2_ref[...]
    h = jnp.maximum(h, 0.0)

    # fc3 + relu
    h = jnp.dot(h.astype(jnp.bfloat16), w3_ref[...],
                preferred_element_type=jnp.float32) + b3_ref[...]
    h = jnp.maximum(h, 0.0)

    # fc4 (out-dim padded to 128 lanes; padded columns carry a -1e30 bias)
    logits = jnp.dot(h.astype(jnp.bfloat16), w4_ref[...],
                     preferred_element_type=jnp.float32) + b4_ref[...]

    # softmax over the class (last) axis, max-stabilized
    m = jnp.max(logits, axis=-1, keepdims=True)
    e = jnp.exp(logits - m)                          # padded cols underflow to 0
    denom = jnp.sum(e, axis=-1, keepdims=True)
    out_ref[...] = (e * pl.reciprocal(denom, approx=True)).astype(out_ref.dtype)


def pack_params(params):
    """Cast weights to bf16 and pad fc4's output dim to a lane-dense 128."""
    n_classes = params["w4"].shape[1]
    nc_pad = _round_up(max(n_classes, LANE), LANE)
    w4 = jnp.zeros((params["w4"].shape[0], nc_pad), jnp.float32)
    w4 = w4.at[:, :n_classes].set(params["w4"])
    # padded classes get a huge negative bias so exp() -> 0 before normalization
    b4 = jnp.full((1, nc_pad), -1e30, jnp.float32)
    b4 = b4.at[:, :n_classes].set(params["b4"])
    packed = {
        "w1": params["w1"].astype(jnp.bfloat16), "b1": params["b1"].astype(jnp.float32),
        "w2": params["w2"].astype(jnp.bfloat16), "b2": params["b2"].astype(jnp.float32),
        "w3": params["w3"].astype(jnp.bfloat16), "b3": params["b3"].astype(jnp.float32),
        "w4": w4.astype(jnp.bfloat16),           "b4": b4,
    }
    return packed, n_classes


@functools.partial(jax.jit, static_argnames=("n_classes", "tile_b"))
def dnnet_forward(x, packed, n_classes, tile_b=512):
    """x: (B, n_features) f32.  packed: output of pack_params."""
    B, n_feat = x.shape
    nc_pad = packed["w4"].shape[1]

    # Large steady-state tile; shrink (to a multiple of 16 for bf16 sublane
    # packing) only when the whole batch is smaller than one tile.
    tb = min(tile_b, _round_up(B, 16))
    B_pad = _round_up(B, tb)

    x_p = x.astype(jnp.bfloat16)
    if B_pad != B:
        x_p = jnp.pad(x_p, ((0, B_pad - B), (0, 0)))

    const = lambda i: (0, 0)   # weights/biases: same block every step -> stay resident

    out = pl.pallas_call(
        dnnet_kernel,
        out_shape=jax.ShapeDtypeStruct((B_pad, nc_pad), jnp.float32),
        grid=(B_pad // tb,),
        in_specs=[
            pl.BlockSpec((tb, n_feat), lambda i: (i, 0)),           # x tile (pipelined)
            pl.BlockSpec(packed["w1"].shape, const), pl.BlockSpec(packed["b1"].shape, const),
            pl.BlockSpec(packed["w2"].shape, const), pl.BlockSpec(packed["b2"].shape, const),
            pl.BlockSpec(packed["w3"].shape, const), pl.BlockSpec(packed["b3"].shape, const),
            pl.BlockSpec(packed["w4"].shape, const), pl.BlockSpec(packed["b4"].shape, const),
        ],
        out_specs=pl.BlockSpec((tb, nc_pad), lambda i: (i, 0)),     # lane-dense (128) store
        compiler_params=pltpu.CompilerParams(
            dimension_semantics=("parallel",)),                     # 2 TCs on v7x
    )(x_p,
      packed["w1"], packed["b1"],
      packed["w2"], packed["b2"],
      packed["w3"], packed["b3"],
      packed["w4"], packed["b4"])

    return out[:B, :n_classes]


def init_params(key, n_features, n_classes):
    """Deterministic init mimicking nn.Linear's U(-1/sqrt(fan_in), 1/sqrt(fan_in))."""
    dims = [(n_features, 128), (128, 64), (64, 32), (32, n_classes)]
    params = {}
    for i, (d_in, d_out) in enumerate(dims, start=1):
        key, kw, kb = jax.random.split(key, 3)
        bound = 1.0 / jnp.sqrt(jnp.float32(d_in))
        # stored as (in, out) so kernel does x @ W  (== x @ W_pt.T in PyTorch)
        params[f"w{i}"] = jax.random.uniform(
            kw, (d_in, d_out), jnp.float32, minval=-bound, maxval=bound)
        params[f"b{i}"] = jax.random.uniform(
            kb, (1, d_out), jnp.float32, minval=-bound, maxval=bound)
    return params


def dnnet_reference(x, params):
    """Pure-JAX f32 reference for correctness checking."""
    h = jnp.maximum(x @ params["w1"] + params["b1"], 0.0)
    h = jnp.maximum(h @ params["w2"] + params["b2"], 0.0)
    h = jnp.maximum(h @ params["w3"] + params["b3"], 0.0)
    logits = h @ params["w4"] + params["b4"]
    return jax.nn.softmax(logits, axis=1)


if __name__ == "__main__":
    n_features = 32
    n_classes = 10
    batch = 8

    key = jax.random.PRNGKey(0)
    key, kx = jax.random.split(key)
    x = jax.random.normal(kx, (batch, n_features), jnp.float32)
    params = init_params(key, n_features, n_classes)
    packed, nc = pack_params(params)

    out = dnnet_forward(x, packed, n_classes=nc)
    out = jax.block_until_ready(out)

    ref = dnnet_reference(x, params)
    assert out.shape == (batch, n_classes)
    # bf16 matmuls + approx reciprocal vs f32 reference -> loose-ish tolerance
    assert jnp.allclose(out, ref, atol=2e-2, rtol=0.0), "mismatch vs reference"
    # rows of softmax must sum to ~1 (approx reciprocal adds ~1e-4 rel error)
    assert jnp.allclose(jnp.sum(out, axis=1), 1.0, atol=5e-3)

    print("KERNEL_OK")
</pallas_src>

<mosaic_0001>
module attributes {stable_mosaic.version = 11 : i64} {
  func.func @dnnet_kernel(%arg0: i32, %arg1: memref<16x32xbf16, #tpu.memory_space<vmem>>, %arg2: memref<32x128xbf16, #tpu.memory_space<vmem>>, %arg3: memref<1x128xf32, #tpu.memory_space<vmem>>, %arg4: memref<128x64xbf16, #tpu.memory_space<vmem>>, %arg5: memref<1x64xf32, #tpu.memory_space<vmem>>, %arg6: memref<64x32xbf16, #tpu.memory_space<vmem>>, %arg7: memref<1x32xf32, #tpu.memory_space<vmem>>, %arg8: memref<32x128xbf16, #tpu.memory_space<vmem>>, %arg9: memref<1x128xf32, #tpu.memory_space<vmem>>, %arg10: memref<16x128xf32, #tpu.memory_space<vmem>>) attributes {dimension_semantics = [#tpu.dimension_semantics<parallel>], iteration_bounds = array<i64: 1>, scalar_prefetch = 0 : i64, scratch_operands = 0 : i64, tpu.core_type = #tpu.core_type<tc>, window_params = [{transform_indices = @transform_0, window_bounds = array<i64: 16, 32>}, {pipeline_mode = #tpu.pipeline_mode<synchronous>, transform_indices = @transform_1, window_bounds = array<i64: 32, 128>}, {pipeline_mode = #tpu.pipeline_mode<synchronous>, transform_indices = @transform_2, window_bounds = array<i64: 1, 128>}, {pipeline_mode = #tpu.pipeline_mode<synchronous>, transform_indices = @transform_3, window_bounds = array<i64: 128, 64>}, {pipeline_mode = #tpu.pipeline_mode<synchronous>, transform_indices = @transform_4, window_bounds = array<i64: 1, 64>}, {pipeline_mode = #tpu.pipeline_mode<synchronous>, transform_indices = @transform_5, window_bounds = array<i64: 64, 32>}, {pipeline_mode = #tpu.pipeline_mode<synchronous>, transform_indices = @transform_6, window_bounds = array<i64: 1, 32>}, {pipeline_mode = #tpu.pipeline_mode<synchronous>, transform_indices = @transform_7, window_bounds = array<i64: 32, 128>}, {pipeline_mode = #tpu.pipeline_mode<synchronous>, transform_indices = @transform_8, window_bounds = array<i64: 1, 128>}, {transform_indices = @transform_9, window_bounds = array<i64: 16, 128>}]} {
    %c0 = arith.constant 0 : index
    %c0_0 = arith.constant 0 : index
    %0 = vector.load %arg1[%c0, %c0_0] : memref<16x32xbf16, #tpu.memory_space<vmem>>, vector<16x32xbf16>
    %c0_1 = arith.constant 0 : index
    %c0_2 = arith.constant 0 : index
    %1 = vector.load %arg2[%c0_1, %c0_2] : memref<32x128xbf16, #tpu.memory_space<vmem>>, vector<32x128xbf16>
    %cst = arith.constant dense<0.000000e+00> : vector<16x128xf32>
    %2 = tpu.matmul %0, %1, %cst {dimension_numbers = #tpu.dot_dimension_numbers<[1], [0], [0], [1], [0, 0, 1, 1], [], []>} : vector<16x32xbf16>, vector<32x128xbf16>, vector<16x128xf32> -> vector<16x128xf32>
    %c0_3 = arith.constant 0 : index
    %c0_4 = arith.constant 0 : index
    %3 = vector.load %arg3[%c0_3, %c0_4] : memref<1x128xf32, #tpu.memory_space<vmem>>, vector<1x128xf32>
    %4 = vector.broadcast %3 : vector<1x128xf32> to vector<16x128xf32>
    %5 = arith.addf %2, %4 : vector<16x128xf32>
    %cst_5 = arith.constant 0.000000e+00 : f32
    %6 = vector.broadcast %cst_5 : f32 to vector<16x128xf32>
    %7 = arith.maximumf %5, %6 : vector<16x128xf32>
    %8 = arith.truncf %7 : vector<16x128xf32> to vector<16x128xbf16>
    %c0_6 = arith.constant 0 : index
    %c0_7 = arith.constant 0 : index
    %9 = vector.load %arg4[%c0_6, %c0_7] : memref<128x64xbf16, #tpu.memory_space<vmem>>, vector<128x64xbf16>
    %cst_8 = arith.constant dense<0.000000e+00> : vector<16x64xf32>
    %10 = tpu.matmul %8, %9, %cst_8 {dimension_numbers = #tpu.dot_dimension_numbers<[1], [0], [0], [1], [0, 0, 1, 1], [], []>} : vector<16x128xbf16>, vector<128x64xbf16>, vector<16x64xf32> -> vector<16x64xf32>
    %c0_9 = arith.constant 0 : index
    %c0_10 = arith.constant 0 : index
    %11 = vector.load %arg5[%c0_9, %c0_10] : memref<1x64xf32, #tpu.memory_space<vmem>>, vector<1x64xf32>
    %12 = vector.broadcast %11 : vector<1x64xf32> to vector<16x64xf32>
    %13 = arith.addf %10, %12 : vector<16x64xf32>
    %cst_11 = arith.constant 0.000000e+00 : f32
    %14 = vector.broadcast %cst_11 : f32 to vector<16x64xf32>
    %15 = arith.maximumf %13, %14 : vector<16x64xf32>
    %16 = arith.truncf %15 : vector<16x64xf32> to vector<16x64xbf16>
    %c0_12 = arith.constant 0 : index
    %c0_13 = arith.constant 0 : index
    %17 = vector.load %arg6[%c0_12, %c0_13] : memref<64x32xbf16, #tpu.memory_space<vmem>>, vector<64x32xbf16>
    %cst_14 = arith.constant dense<0.000000e+00> : vector<16x32xf32>
    %18 = tpu.matmul %16, %17, %cst_14 {dimension_numbers = #tpu.dot_dimension_numbers<[1], [0], [0], [1], [0, 0, 1, 1], [], []>} : vector<16x64xbf16>, vector<64x32xbf16>, vector<16x32xf32> -> vector<16x32xf32>
    %c0_15 = arith.constant 0 : index
    %c0_16 = arith.constant 0 : index
    %19 = vector.load %arg7[%c0_15, %c0_16] : memref<1x32xf32, #tpu.memory_space<vmem>>, vector<1x32xf32>
    %20 = vector.broadcast %19 : vector<1x32xf32> to vector<16x32xf32>
    %21 = arith.addf %18, %20 : vector<16x32xf32>
    %cst_17 = arith.constant 0.000000e+00 : f32
    %22 = vector.broadcast %cst_17 : f32 to vector<16x32xf32>
    %23 = arith.maximumf %21, %22 : vector<16x32xf32>
    %24 = arith.truncf %23 : vector<16x32xf32> to vector<16x32xbf16>
    %c0_18 = arith.constant 0 : index
    %c0_19 = arith.constant 0 : index
    %25 = vector.load %arg8[%c0_18, %c0_19] : memref<32x128xbf16, #tpu.memory_space<vmem>>, vector<32x128xbf16>
    %cst_20 = arith.constant dense<0.000000e+00> : vector<16x128xf32>
    %26 = tpu.matmul %24, %25, %cst_20 {dimension_numbers = #tpu.dot_dimension_numbers<[1], [0], [0], [1], [0, 0, 1, 1], [], []>} : vector<16x32xbf16>, vector<32x128xbf16>, vector<16x128xf32> -> vector<16x128xf32>
    %c0_21 = arith.constant 0 : index
    %c0_22 = arith.constant 0 : index
    %27 = vector.load %arg9[%c0_21, %c0_22] : memref<1x128xf32, #tpu.memory_space<vmem>>, vector<1x128xf32>
    %28 = vector.broadcast %27 : vector<1x128xf32> to vector<16x128xf32>
    %29 = arith.addf %26, %28 : vector<16x128xf32>
    %cst_23 = arith.constant dense<0xFF800000> : vector<16xf32>
    %30 = vector.multi_reduction <maximumf>, %29, %cst_23 [1] : vector<16x128xf32> to vector<16xf32>
    %31 = vector.shape_cast %30 : vector<16xf32> to vector<16x1xf32>
    %32 = vector.broadcast %31 : vector<16x1xf32> to vector<16x128xf32>
    %33 = arith.subf %29, %32 : vector<16x128xf32>
    %34 = math.exp %33 : vector<16x128xf32>
    %cst_24 = arith.constant dense<0.000000e+00> : vector<16xf32>
    %35 = vector.multi_reduction <add>, %34, %cst_24 [1] : vector<16x128xf32> to vector<16xf32>
    %36 = vector.shape_cast %35 : vector<16xf32> to vector<16x1xf32>
    %37 = tpu.reciprocal %36 {approx = true} : vector<16x1xf32> -> vector<16x1xf32>
    %38 = vector.broadcast %37 : vector<16x1xf32> to vector<16x128xf32>
    %39 = arith.mulf %34, %38 : vector<16x128xf32>
    %c0_25 = arith.constant 0 : index
    %c0_26 = arith.constant 0 : index
    %40 = vector.load %arg10[%c0_25, %c0_26] : memref<16x128xf32, #tpu.memory_space<vmem>>, vector<16x128xf32>
    tpu.vector_store %arg10[%c0_25, %c0_26], %39 {strides = array<i32>} : memref<16x128xf32, #tpu.memory_space<vmem>>, vector<16x128xf32>,
    return
  }
  func.func @transform_0(%arg0: i32) -> (i32, i32) {
    %c0_i32 = arith.constant 0 : i32
    %c0_i32_0 = arith.constant 0 : i32
    return %arg0, %c0_i32 : i32, i32
  }
  func.func @transform_1(%arg0: i32) -> (i32, i32) {
    %c0_i32 = arith.constant 0 : i32
    %c0_i32_0 = arith.constant 0 : i32
    %c0_i32_1 = arith.constant 0 : i32
    return %c0_i32, %c0_i32_0 : i32, i32
  }
  func.func @transform_2(%arg0: i32) -> (i32, i32) {
    %c0_i32 = arith.constant 0 : i32
    %c0_i32_0 = arith.constant 0 : i32
    %c0_i32_1 = arith.constant 0 : i32
    return %c0_i32, %c0_i32_0 : i32, i32
  }
  func.func @transform_3(%arg0: i32) -> (i32, i32) {
    %c0_i32 = arith.constant 0 : i32
    %c0_i32_0 = arith.constant 0 : i32
    %c0_i32_1 = arith.constant 0 : i32
    return %c0_i32, %c0_i32_0 : i32, i32
  }
  func.func @transform_4(%arg0: i32) -> (i32, i32) {
    %c0_i32 = arith.constant 0 : i32
    %c0_i32_0 = arith.constant 0 : i32
    %c0_i32_1 = arith.constant 0 : i32
    return %c0_i32, %c0_i32_0 : i32, i32
  }
  func.func @transform_5(%arg0: i32) -> (i32, i32) {
    %c0_i32 = arith.constant 0 : i32
    %c0_i32_0 = arith.constant 0 : i32
    %c0_i32_1 = arith.constant 0 : i32
    return %c0_i32, %c0_i32_0 : i32, i32
  }
  func.func @transform_6(%arg0: i32) -> (i32, i32) {
    %c0_i32 = arith.constant 0 : i32
    %c0_i32_0 = arith.constant 0 : i32
    %c0_i32_1 = arith.constant 0 : i32
    return %c0_i32, %c0_i32_0 : i32, i32
  }
  func.func @transform_7(%arg0: i32) -> (i32, i32) {
    %c0_i32 = arith.constant 0 : i32
    %c0_i32_0 = arith.constant 0 : i32
    %c0_i32_1 = arith.constant 0 : i32
    return %c0_i32, %c0_i32_0 : i32, i32
  }
  func.func @transform_8(%arg0: i32) -> (i32, i32) {
    %c0_i32 = arith.constant 0 : i32
    %c0_i32_0 = arith.constant 0 : i32
    %c0_i32_1 = arith.constant 0 : i32
    return %c0_i32, %c0_i32_0 : i32, i32
  }
  func.func @transform_9(%arg0: i32) -> (i32, i32) {
    %c0_i32 = arith.constant 0 : i32
    %c0_i32_0 = arith.constant 0 : i32
    return %arg0, %c0_i32 : i32, i32
  }
}

</mosaic_0001>

<bundles_post_ra>
// kernel: dnnet_forward.1
= control target key start
LH: loop header
LB: loop body
LE: loop exit
PB: predicated region body
PF: predicated region fallthrough
CT: control target
= control target key end

     0   :  { %v523_v0 = vmov 0.0   ;;  %vm524_vm0 = vmmov 0   ;;  %vm63_vm1 = vcmask 261120   ;;  %vm265_vm2 = vcmask 523264   ;;  %s670_s1 = inlined_call_operand.vmem [shape: bf16[32,128], index: 1, kind: input, shape index: {}]   ;;  %s671_s3 = inlined_call_operand.vmem [shape: bf16[128,64], index: 3, kind: input, shape index: {}]   ;;  %s672_s0 = inlined_call_operand.vmem [shape: bf16[16,32], index: 0, kind: input, shape index: {}]   ;;  %s673_s5 = inlined_call_operand.vmem [shape: bf16[64,32], index: 5, kind: input, shape index: {}]   ;;  %s674_s2 = inlined_call_operand.vmem [shape: f32[1,128], index: 2, kind: input, shape index: {}]   ;;  %s675_s4 = inlined_call_operand.vmem [shape: f32[1,64], index: 4, kind: input, shape index: {}]   ;;  %s676_s7 = inlined_call_operand.vmem [shape: bf16[32,128], index: 7, kind: input, shape index: {}]   ;;  %s677_s6 = inlined_call_operand.vmem [shape: f32[1,32], index: 6, kind: input, shape index: {}]   ;;  %s678_s8 = inlined_call_operand.vmem [shape: f32[1,128], index: 8, kind: input, shape index: {}]   ;;  %s679_s9 = inlined_call_operand.vmem [shape: f32[16,128], index: 9, kind: output, shape index: {}]  }
   0x1   :  { %448 = vmatprep.subr.bf16.mxu0 %v523_v0  ;;  %v498_v1 = vld [vmem:[%s670_s1] sm:$0xff]   ;;  %452 = vmatprep.mubr.msk.bf16.mxu0 %vm524_vm0, %v523_v0  ;;  %v499_v2 = vld [vmem:[%s670_s1 + $0x8] sm:$0xff]   ;;  %v503_v6 = vld [vmem:[%s671_s3 + $0x10] sm:$0xff]  }
   0x2   :  { %456 = vmatprep.subr.bf16.mxu1 %v523_v0  ;;  %472 = vmatprep.mubr.msk.bf16.mxu1 %vm524_vm0, %v523_v0  ;;  %v501_v3 = vld [vmem:[%s671_s3] sm:$0xff]   ;;  %v502_v5 = vld [vmem:[%s671_s3 + $0x8] sm:$0xff]   ;;  %v504_v7 = vld [vmem:[%s671_s3 + $0x18] sm:$0xff]  }
   0x3   :  { %449 = vmatpush3.bf16.msra.mxu0 %v498_v1  ;;  %v500_v4 = vld [vmem:[%s672_s0] sm:$0xff]   ;;  %457 = vmatpush3.bf16.msra.mxu1 %v501_v3  ;;  %v506_v9 = vld [vmem:[%s671_s3 + $0x28] sm:$0xff]   ;;  %v507_v10 = vld [vmem:[%s671_s3 + $0x30] sm:$0xff]  }
   0x4   :  { %450 = vmatprep.subr.bf16.mxu0 %v523_v0  ;;  %458 = vmatprep.subr.bf16.mxu1 %v523_v0  ;;  %v505_v8 = vld [vmem:[%s671_s3 + $0x20] sm:$0xff]   ;;  %v508_v11 = vld [vmem:[%s671_s3 + $0x38] sm:$0xff]   ;;  %v510_v13 = vld [vmem:[%s673_s5 + $0x8] sm:$0xff]  }
   0x5   :  { %v509_v12 = vld [vmem:[%s673_s5] sm:$0xff]   ;;  %v511_v24 = vld [vmem:[%s673_s5 + $0x10] sm:$0xff]   ;;  %v512_v25 = vld [vmem:[%s673_s5 + $0x18] sm:$0xff]  }
   0x6   :  { %v404_v14 = vld [vmem:[%s674_s2] ss:$0 sm:$0xff]  ;;  %v514_v37 = vld [vmem:[%s676_s7 + $0x8] sm:$0xff]  }
   0x7   :  { %451 = vmatpush3.bf16.msra.mxu0 %v499_v2  ;;  %459 = vmatpush3.bf16.msra.mxu1 %v502_v5  ;;  %v409_v26 = vld [vmem:[%s675_s4] ss:$0 sm:$0xff] }
   0x8   :  { %476 = vmatprep.subr.bf16.mxu0 %v523_v0  ;;  %460 = vmatprep.subr.bf16.mxu1 %v523_v0  ;;  %v513_v36 = vld [vmem:[%s676_s7] sm:$0xff]  }
   0x9   :  { %v418_v38 = vld [vmem:[%s677_s6] ss:$0 sm:$0xff] }
   0xa   :  { %453 = vmatmul.mubr.msk.bf16.vlgmr.msra.gmra.mrb[0].mxu0 %vm63_vm1, %v500_v4  ;;  %v424_v48 = vld [vmem:[%s678_s8] ss:$0 sm:$0xff] }
   0xb   :  { %484 = vmatprep.mubr.msk.bf16.mxu0 %vm524_vm0, %v523_v0  ;;  %461 = vmatpush3.bf16.msra.mxu1 %v503_v6 }
   0xc   :  { %462 = vmatprep.subr.bf16.mxu1 %v523_v0  ;;  %477 = vmatpush3.bf16.msra.mxu0 %v509_v12 }
   0xd   :  { %478 = vmatprep.subr.bf16.mxu0 %v523_v0 }
   0xf   :  { %463 = vmatpush3.bf16.msra.mxu1 %v504_v7 }
  0x10   :  { %464 = vmatprep.subr.bf16.mxu1 %v523_v0  ;;  %479 = vmatpush3.bf16.msra.mxu0 %v510_v13 }
  0x11   :  { %480 = vmatprep.subr.bf16.mxu0 %v523_v0 }
  0x13   :  { %465 = vmatpush3.bf16.msra.mxu1 %v505_v8 }
  0x14   :  { %466 = vmatprep.subr.bf16.mxu1 %v523_v0  ;;  %481 = vmatpush3.bf16.msra.mxu0 %v511_v24 }
  0x15   :  { %482 = vmatprep.subr.bf16.mxu0 %v523_v0 }
  0x17   :  { %467 = vmatpush3.bf16.msra.mxu1 %v506_v9 }
  0x18   :  { %468 = vmatprep.subr.bf16.mxu1 %v523_v0  ;;  %483 = vmatpush3.bf16.msra.mxu0 %v512_v25 }
  0x19   :  { %488 = vmatprep.subr.bf16.mxu0 %v523_v0 }
  0x1b   :  { %469 = vmatpush3.bf16.msra.mxu1 %v507_v10 }
  0x1c   :  { %470 = vmatprep.subr.bf16.mxu1 %v523_v0 }
  0x1f   :  { %471 = vmatpush3.bf16.msra.mxu1 %v508_v11 }
  0xdd   :  { %v101_v15 = vpop.f32.mrb[0].mxu0 }
  0xde   :  { %v102_v16 = vadd.f32 %v404_v14, %v101_v15  ;;  %v454_v17 = vpop.f32.mrb[1].mxu0 }
  0xdf   :  { %v104_v18 = vpop.f32.mrb[2].mxu0 }
  0xe0   :  { %v105_v19 = vadd.f32 %v404_v14, %v104_v18  ;;  %v455_v20 = vpop.f32.mrb[3].mxu0  ;;  %v108_v21 = vmax.f32 %v102_v16, 0.0 }
  0xe2   :  { %v109_v22 = vmax.f32 %v105_v19, 0.0 }
  0xe4   :  { %v110_v23 = vpack.c.bf16 %v109_v22, %v108_v21 }
  0xe6   :  { %473 = vmatmul.mubr.bf16.vlgmr.msra.gmra.mrb[0].mxu1 %v110_v23 }
 0x1b9   :  { %v216_v27 = vpop.f32.mrb[0].mxu1 }
 0x1ba   :  { %v217_v28 = vadd.f32 %v409_v26, %v216_v27  ;;  %v474_v29 = vpop.f32.mrb[1].mxu1 }
 0x1bb   :  { %v219_v30 = vpop.f32.mrb[2].mxu1 }
 0x1bc   :  { %v220_v31 = vadd.f32 %v409_v26, %v219_v30  ;;  %v475_v32 = vpop.f32.mrb[3].mxu1  ;;  %v223_v33 = vmax.f32 %v217_v28, 0.0 }
 0x1be   :  { %v224_v34 = vmax.f32 %v220_v31, 0.0 }
 0x1c0   :  { %v225_v35 = vpack.c.bf16 %v224_v34, %v223_v33 }
 0x1c2   :  { %485 = vmatmul.mubr.msk.bf16.vlgmr.msra.gmra.mrb[4].mxu0 %vm265_vm2, %v225_v35 }
 0x1c3   :  { %492 = vmatprep.mubr.msk.bf16.mxu0 %vm524_vm0, %v523_v0  ;;  %489 = vmatpush3.bf16.msra.mxu0 %v513_v36 }
 0x1c4   :  { %490 = vmatprep.subr.bf16.mxu0 %v523_v0 }
 0x1c7   :  { %491 = vmatpush3.bf16.msra.mxu0 %v514_v37 }
 0x295   :  { %v303_v39 = vpop.f32.mrb[4].mxu0 }
 0x296   :  { %v304_v40 = vadd.f32 %v418_v38, %v303_v39  ;;  %v486_v41 = vpop.f32.mrb[5].mxu0 }
 0x297   :  { %v306_v42 = vpop.f32.mrb[6].mxu0 }
 0x298   :  { %v307_v43 = vadd.f32 %v418_v38, %v306_v42  ;;  %v487_v44 = vpop.f32.mrb[7].mxu0  ;;  %v310_v45 = vmax.f32 %v304_v40, 0.0 }
 0x29a   :  { %v311_v46 = vmax.f32 %v307_v43, 0.0 }
 0x29c   :  { %v312_v47 = vpack.c.bf16 %v311_v46, %v310_v45 }
 0x29e   :  { %493 = vmatmul.mubr.msk.bf16.vlgmr.msra.gmra.mrb[8].mxu0 %vm63_vm1, %v312_v47 }
 0x371   :  { %v373_v49 = vpop.f32.mrb[8].mxu0 }
 0x372   :  { %v374_v50 = vadd.f32 %v424_v48, %v373_v49  ;;  %v494_v51 = vpop.f32.mrb[9].mxu0 }
 0x373   :  { %v376_v52 = vpop.f32.mrb[10].mxu0 }
 0x374   :  { %380 = vmax.xlane.f32.xlu0 %v374_v50  ;;  %v495_v53 = vpop.f32.mrb[11].mxu0  ;;  %v377_v54 = vadd.f32 %v424_v48, %v376_v52 }
 0x378   :  { %382 = vmax.xlane.f32.xlu0 %v377_v54 }
 0x401   :  { %v381_v55 = vpop.xlane.xlu0 %380 }
 0x402   :  { %v384_v56 = vsub.f32 %v374_v50, %v381_v55 }
 0x404   :  { %v386_v57 = vmul.f32 1.442695, %v384_v56 }
 0x405   :  { %v383_v58 = vpop.xlane.xlu0 %382 }
 0x406   :  { %515 = vpow2.f32 %v386_v57  ;;  %v385_v59 = vsub.f32 %v377_v54, %v383_v58 }
 0x408   :  { %v388_v60 = vmul.f32 1.442695, %v385_v59 }
 0x40a   :  { %517 = vpow2.f32 %v388_v60 }
 0x410   :  { %v516_v61 = vpop.eup %515 }
 0x411   :  { %390 = vadd.xlane.f32.xlu1 %v516_v61 }
 0x414   :  { %v518_v62 = vpop.eup %517 }
 0x415   :  { %392 = vadd.xlane.f32.xlu1 %v518_v62 }
 0x49e   :  { %v391_v63 = vpop.xlane.xlu1 %390 }
 0x49f   :  { %519 = vrcp.f32 %v391_v63 }
 0x4a2   :  { %v393_v0 = vpop.xlane.xlu1 %392 }
 0x4a3   :  { %521 = vrcp.f32 %v393_v0 }
 0x4a9   :  { %v520_v1 = vpop.eup %519 }
 0x4aa   :  { %v396_v2 = vmul.f32 %v520_v1, %v516_v61 }
 0x4ac   :  { %398 = vst [vmem:[%s679_s9] sm:$0xff] %v396_v2 }
 0x4ad   :  { %v522_v3 = vpop.eup %521 }
 0x4ae   :  { %v397_v4 = vmul.f32 %v522_v3, %v518_v62 }
 0x4b0   :  { %399 = vst [vmem:[%s679_s9 + $0x8] sm:$0xff] %v397_v4 }

</bundles_post_ra>
